<compile_context>
chip_gen: v6e
topology: v6e:2x2x1
jax: 0.10.0
libtpu: 0.0.40
codegen_flags: <defaults>
</compile_context>

<pallas_src>
import jax
import jax.numpy as jnp
from jax import lax
from jax.experimental import pallas as pl
from jax.experimental.pallas import tpu as pltpu

# ---- module-consistent shapes ----
B, H, W, CIN = 2, 16, 16, 4      # input: (batch, height, width, in_channels), NHWC
FEAT = 32                        # stand-in for self.model.classifier.in_features
HID = FEAT * 2                   # mlp hidden_size = in_features * 2
NUM_CLS = 6                      # HMS has 6 classes
KH = KW = 3                      # conv stem kernel
K_RAW = KH * KW * CIN            # 36 (im2col contraction dim)

# ---- TPU-friendly padded / tiled sizes ----
LANE = 128                       # lane width
KPAD = 128                       # im2col K padded to a full lane group
BPAD = 8                         # batch rows padded to one sublane group
ROWS = B * H * W                 # 512 spatial rows after im2col
TILE = 128                       # rows processed per inner-loop step
NTILE = ROWS // TILE             # 4


def hms_kernel(patch_ref, cw_ref, avg_ref, w12_ref, w3_ref, bias_ref, out_ref):
    # ---------- backbone stand-in ----------
    # TODO(synk): the full timm backbone has no clean Pallas equivalent; a
    # deterministic conv-stem feature extractor stands in for `self.model`.
    cw = cw_ref[...]                        # (KPAD, LANE) bf16, lane-dense conv weight
    cb = bias_ref[0:1, :]                   # (1, LANE) f32 conv bias (padded lanes are 0)

    def body(t, feat_acc):
        p = patch_ref[t]                                            # (TILE, KPAD) bf16
        acc = jnp.dot(p, cw, preferred_element_type=jnp.float32)    # (TILE, LANE) f32
        acc = acc + cb
        act = acc * jax.nn.sigmoid(acc)                             # SiLU in f32
        a = avg_ref[t]                                              # (BPAD, TILE) bf16
        # partial global-average-pool as a small MXU dot (keeps it off the XLU)
        return feat_acc + jnp.dot(a, act.astype(jnp.bfloat16),
                                  preferred_element_type=jnp.float32)

    feat = lax.fori_loop(0, NTILE, body,
                         jnp.zeros((BPAD, LANE), jnp.float32), unroll=True)

    # ---------- mlp head:  l3( SiLU(l2(x)) * l1(x) )  (l1|l2 fused) ----------
    h12 = jnp.dot(feat.astype(jnp.bfloat16), w12_ref[...],
                  preferred_element_type=jnp.float32) + bias_ref[1:2, :]   # (BPAD, 2*HID)
    h1 = h12[:, :HID]
    h2 = h12[:, HID:]
    gate = h2 * jax.nn.sigmoid(h2)                                  # SiLU(l2(x)) in f32
    g = (gate * h1).astype(jnp.bfloat16)                            # (BPAD, HID)
    out = jnp.dot(g, w3_ref[...], preferred_element_type=jnp.float32) + bias_ref[2:3, :]
    out_ref[...] = out.astype(out_ref.dtype)                        # full (8,128) store


def init_params(key):
    ks = jax.random.split(key, 8)
    scale = 0.05
    return {
        "cw": scale * jax.random.normal(ks[0], (KH, KW, CIN, FEAT), jnp.float32),
        "cb": scale * jax.random.normal(ks[1], (FEAT,), jnp.float32),
        "w1": scale * jax.random.normal(ks[2], (FEAT, HID), jnp.float32),
        "b1": scale * jax.random.normal(ks[3], (HID,), jnp.float32),
        "w2": scale * jax.random.normal(ks[4], (FEAT, HID), jnp.float32),
        "b2": scale * jax.random.normal(ks[5], (HID,), jnp.float32),
        "w3": scale * jax.random.normal(ks[6], (HID, NUM_CLS), jnp.float32),
        "b3": scale * jax.random.normal(ks[7], (NUM_CLS,), jnp.float32),
    }


@jax.jit
def hms_forward(x_nhwc, params):
    x = x_nhwc.astype(jnp.float32)

    # --- glue: im2col (conv padding=1) built in plain JAX, K padded to 128 ---
    x_pad = jnp.pad(x, ((0, 0), (1, 1), (1, 1), (0, 0)))
    cols = [x_pad[:, ky:ky + H, kx:kx + W, :] for ky in range(KH) for kx in range(KW)]
    patches = jnp.stack(cols, axis=3).reshape(ROWS, K_RAW)            # (512, 36)
    patches = jnp.pad(patches, ((0, 0), (0, KPAD - K_RAW)))
    patches = patches.reshape(NTILE, TILE, KPAD).astype(jnp.bfloat16)  # (4,128,128)

    # conv weight (KH,KW,CIN,FEAT) -> im2col layout, lane/K padded, bf16
    cw = params["cw"].reshape(K_RAW, FEAT)
    cw = jnp.pad(cw, ((0, KPAD - K_RAW), (0, LANE - FEAT))).astype(jnp.bfloat16)

    # per-batch global-average-pool matrix, tiled along the 512-row axis
    avg = jnp.kron(jnp.eye(B, dtype=jnp.float32),
                   jnp.full((1, H * W), 1.0 / (H * W), jnp.float32))   # (B, 512)
    avg = jnp.pad(avg, ((0, BPAD - B), (0, 0)))                        # (8, 512)
    avg = avg.reshape(BPAD, NTILE, TILE).transpose(1, 0, 2).astype(jnp.bfloat16)  # (4,8,128)

    # fused head weights (l1 | l2): (FEAT, 2*HID)=(32,128), K padded to 128, bf16
    w12 = jnp.concatenate([params["w1"], params["w2"]], axis=1)
    w12 = jnp.pad(w12, ((0, KPAD - FEAT), (0, 0))).astype(jnp.bfloat16)  # (128,128)
    w3 = jnp.pad(params["w3"], ((0, 0), (0, LANE - NUM_CLS))).astype(jnp.bfloat16)  # (64,128)

    # all biases packed into a single (3, 128) f32 array (one DMA)
    bias = jnp.zeros((3, LANE), jnp.float32)
    bias = bias.at[0, :FEAT].set(params["cb"])
    bias = bias.at[1, :2 * HID].set(jnp.concatenate([params["b1"], params["b2"]]))
    bias = bias.at[2, :NUM_CLS].set(params["b3"])

    vmem = lambda: pl.BlockSpec(memory_space=pltpu.MemorySpace.VMEM)
    out_pad = pl.pallas_call(
        hms_kernel,
        out_shape=jax.ShapeDtypeStruct((BPAD, LANE), jnp.float32),
        in_specs=[vmem() for _ in range(6)],
        out_specs=vmem(),
    )(patches, cw, avg, w12, w3, bias)

    return out_pad[:B, :NUM_CLS]


if __name__ == "__main__":
    key = jax.random.PRNGKey(0)
    k_x, k_p = jax.random.split(key)
    x = jax.random.normal(k_x, (B, H, W, CIN), jnp.float32)   # NHWC input
    params = init_params(k_p)

    out = hms_forward(x, params)
    out = jax.block_until_ready(out)
    assert out.shape == (B, NUM_CLS), out.shape
    assert bool(jnp.all(jnp.isfinite(out)))
    print("KERNEL_OK")
</pallas_src>

<mosaic_0001>
module attributes {stable_mosaic.version = 11 : i64} {
  func.func @hms_kernel(%arg0: memref<4x128x128xbf16, #tpu.memory_space<vmem>>, %arg1: memref<128x128xbf16, #tpu.memory_space<vmem>>, %arg2: memref<4x8x128xbf16, #tpu.memory_space<vmem>>, %arg3: memref<128x128xbf16, #tpu.memory_space<vmem>>, %arg4: memref<64x128xbf16, #tpu.memory_space<vmem>>, %arg5: memref<3x128xf32, #tpu.memory_space<vmem>>, %arg6: memref<8x128xf32, #tpu.memory_space<vmem>>) attributes {dimension_semantics = [], scalar_prefetch = 0 : i64, scratch_operands = 0 : i64, tpu.core_type = #tpu.core_type<tc>} {
    %c0 = arith.constant 0 : index
    %c0_0 = arith.constant 0 : index
    %0 = vector.load %arg1[%c0, %c0_0] : memref<128x128xbf16, #tpu.memory_space<vmem>>, vector<128x128xbf16>
    %c0_1 = arith.constant 0 : index
    %c0_2 = arith.constant 0 : index
    %1 = vector.load %arg5[%c0_1, %c0_2] : memref<3x128xf32, #tpu.memory_space<vmem>>, vector<1x128xf32>
    %cst = arith.constant 0.000000e+00 : f32
    %2 = vector.broadcast %cst : f32 to vector<8x128xf32>
    %c0_i32 = arith.constant 0 : i32
    %3 = arith.index_cast %c0_i32 : i32 to index
    %c0_3 = arith.constant 0 : index
    %c0_4 = arith.constant 0 : index
    %4 = vector.load %arg0[%3, %c0_3, %c0_4] : memref<4x128x128xbf16, #tpu.memory_space<vmem>>, vector<1x128x128xbf16>
    %5 = vector.shape_cast %4 : vector<1x128x128xbf16> to vector<128x128xbf16>
    %cst_5 = arith.constant dense<0.000000e+00> : vector<128x128xf32>
    %6 = tpu.matmul %5, %0, %cst_5 {dimension_numbers = #tpu.dot_dimension_numbers<[1], [0], [0], [1], [0, 0, 1, 1], [], []>} : vector<128x128xbf16>, vector<128x128xbf16>, vector<128x128xf32> -> vector<128x128xf32>
    %7 = vector.broadcast %1 : vector<1x128xf32> to vector<128x128xf32>
    %8 = arith.addf %6, %7 : vector<128x128xf32>
    %9 = arith.negf %8 : vector<128x128xf32>
    %10 = math.exp %9 : vector<128x128xf32>
    %cst_6 = arith.constant 1.000000e+00 : f32
    %11 = vector.broadcast %cst_6 : f32 to vector<128x128xf32>
    %12 = arith.addf %11, %10 : vector<128x128xf32>
    %13 = arith.divf %11, %12 : vector<128x128xf32>
    %14 = arith.mulf %8, %13 : vector<128x128xf32>
    %15 = arith.index_cast %c0_i32 : i32 to index
    %c0_7 = arith.constant 0 : index
    %c0_8 = arith.constant 0 : index
    %16 = vector.load %arg2[%15, %c0_7, %c0_8] : memref<4x8x128xbf16, #tpu.memory_space<vmem>>, vector<1x8x128xbf16>
    %17 = vector.shape_cast %16 : vector<1x8x128xbf16> to vector<8x128xbf16>
    %18 = arith.truncf %14 : vector<128x128xf32> to vector<128x128xbf16>
    %cst_9 = arith.constant dense<0.000000e+00> : vector<8x128xf32>
    %19 = tpu.matmul %17, %18, %cst_9 {dimension_numbers = #tpu.dot_dimension_numbers<[1], [0], [0], [1], [0, 0, 1, 1], [], []>} : vector<8x128xbf16>, vector<128x128xbf16>, vector<8x128xf32> -> vector<8x128xf32>
    %20 = arith.addf %2, %19 : vector<8x128xf32>
    %c1_i32 = arith.constant 1 : i32
    %21 = arith.index_cast %c1_i32 : i32 to index
    %c0_10 = arith.constant 0 : index
    %c0_11 = arith.constant 0 : index
    %22 = vector.load %arg0[%21, %c0_10, %c0_11] : memref<4x128x128xbf16, #tpu.memory_space<vmem>>, vector<1x128x128xbf16>
    %23 = vector.shape_cast %22 : vector<1x128x128xbf16> to vector<128x128xbf16>
    %cst_12 = arith.constant dense<0.000000e+00> : vector<128x128xf32>
    %24 = tpu.matmul %23, %0, %cst_12 {dimension_numbers = #tpu.dot_dimension_numbers<[1], [0], [0], [1], [0, 0, 1, 1], [], []>} : vector<128x128xbf16>, vector<128x128xbf16>, vector<128x128xf32> -> vector<128x128xf32>
    %25 = vector.broadcast %1 : vector<1x128xf32> to vector<128x128xf32>
    %26 = arith.addf %24, %25 : vector<128x128xf32>
    %27 = arith.negf %26 : vector<128x128xf32>
    %28 = math.exp %27 : vector<128x128xf32>
    %cst_13 = arith.constant 1.000000e+00 : f32
    %29 = vector.broadcast %cst_13 : f32 to vector<128x128xf32>
    %30 = arith.addf %29, %28 : vector<128x128xf32>
    %31 = arith.divf %29, %30 : vector<128x128xf32>
    %32 = arith.mulf %26, %31 : vector<128x128xf32>
    %33 = arith.index_cast %c1_i32 : i32 to index
    %c0_14 = arith.constant 0 : index
    %c0_15 = arith.constant 0 : index
    %34 = vector.load %arg2[%33, %c0_14, %c0_15] : memref<4x8x128xbf16, #tpu.memory_space<vmem>>, vector<1x8x128xbf16>
    %35 = vector.shape_cast %34 : vector<1x8x128xbf16> to vector<8x128xbf16>
    %36 = arith.truncf %32 : vector<128x128xf32> to vector<128x128xbf16>
    %cst_16 = arith.constant dense<0.000000e+00> : vector<8x128xf32>
    %37 = tpu.matmul %35, %36, %cst_16 {dimension_numbers = #tpu.dot_dimension_numbers<[1], [0], [0], [1], [0, 0, 1, 1], [], []>} : vector<8x128xbf16>, vector<128x128xbf16>, vector<8x128xf32> -> vector<8x128xf32>
    %38 = arith.addf %20, %37 : vector<8x128xf32>
    %c2_i32 = arith.constant 2 : i32
    %39 = arith.index_cast %c2_i32 : i32 to index
    %c0_17 = arith.constant 0 : index
    %c0_18 = arith.constant 0 : index
    %40 = vector.load %arg0[%39, %c0_17, %c0_18] : memref<4x128x128xbf16, #tpu.memory_space<vmem>>, vector<1x128x128xbf16>
    %41 = vector.shape_cast %40 : vector<1x128x128xbf16> to vector<128x128xbf16>
    %cst_19 = arith.constant dense<0.000000e+00> : vector<128x128xf32>
    %42 = tpu.matmul %41, %0, %cst_19 {dimension_numbers = #tpu.dot_dimension_numbers<[1], [0], [0], [1], [0, 0, 1, 1], [], []>} : vector<128x128xbf16>, vector<128x128xbf16>, vector<128x128xf32> -> vector<128x128xf32>
    %43 = vector.broadcast %1 : vector<1x128xf32> to vector<128x128xf32>
    %44 = arith.addf %42, %43 : vector<128x128xf32>
    %45 = arith.negf %44 : vector<128x128xf32>
    %46 = math.exp %45 : vector<128x128xf32>
    %cst_20 = arith.constant 1.000000e+00 : f32
    %47 = vector.broadcast %cst_20 : f32 to vector<128x128xf32>
    %48 = arith.addf %47, %46 : vector<128x128xf32>
    %49 = arith.divf %47, %48 : vector<128x128xf32>
    %50 = arith.mulf %44, %49 : vector<128x128xf32>
    %51 = arith.index_cast %c2_i32 : i32 to index
    %c0_21 = arith.constant 0 : index
    %c0_22 = arith.constant 0 : index
    %52 = vector.load %arg2[%51, %c0_21, %c0_22] : memref<4x8x128xbf16, #tpu.memory_space<vmem>>, vector<1x8x128xbf16>
    %53 = vector.shape_cast %52 : vector<1x8x128xbf16> to vector<8x128xbf16>
    %54 = arith.truncf %50 : vector<128x128xf32> to vector<128x128xbf16>
    %cst_23 = arith.constant dense<0.000000e+00> : vector<8x128xf32>
    %55 = tpu.matmul %53, %54, %cst_23 {dimension_numbers = #tpu.dot_dimension_numbers<[1], [0], [0], [1], [0, 0, 1, 1], [], []>} : vector<8x128xbf16>, vector<128x128xbf16>, vector<8x128xf32> -> vector<8x128xf32>
    %56 = arith.addf %38, %55 : vector<8x128xf32>
    %c3_i32 = arith.constant 3 : i32
    %57 = arith.index_cast %c3_i32 : i32 to index
    %c0_24 = arith.constant 0 : index
    %c0_25 = arith.constant 0 : index
    %58 = vector.load %arg0[%57, %c0_24, %c0_25] : memref<4x128x128xbf16, #tpu.memory_space<vmem>>, vector<1x128x128xbf16>
    %59 = vector.shape_cast %58 : vector<1x128x128xbf16> to vector<128x128xbf16>
    %cst_26 = arith.constant dense<0.000000e+00> : vector<128x128xf32>
    %60 = tpu.matmul %59, %0, %cst_26 {dimension_numbers = #tpu.dot_dimension_numbers<[1], [0], [0], [1], [0, 0, 1, 1], [], []>} : vector<128x128xbf16>, vector<128x128xbf16>, vector<128x128xf32> -> vector<128x128xf32>
    %61 = vector.broadcast %1 : vector<1x128xf32> to vector<128x128xf32>
    %62 = arith.addf %60, %61 : vector<128x128xf32>
    %63 = arith.negf %62 : vector<128x128xf32>
    %64 = math.exp %63 : vector<128x128xf32>
    %cst_27 = arith.constant 1.000000e+00 : f32
    %65 = vector.broadcast %cst_27 : f32 to vector<128x128xf32>
    %66 = arith.addf %65, %64 : vector<128x128xf32>
    %67 = arith.divf %65, %66 : vector<128x128xf32>
    %68 = arith.mulf %62, %67 : vector<128x128xf32>
    %69 = arith.index_cast %c3_i32 : i32 to index
    %c0_28 = arith.constant 0 : index
    %c0_29 = arith.constant 0 : index
    %70 = vector.load %arg2[%69, %c0_28, %c0_29] : memref<4x8x128xbf16, #tpu.memory_space<vmem>>, vector<1x8x128xbf16>
    %71 = vector.shape_cast %70 : vector<1x8x128xbf16> to vector<8x128xbf16>
    %72 = arith.truncf %68 : vector<128x128xf32> to vector<128x128xbf16>
    %cst_30 = arith.constant dense<0.000000e+00> : vector<8x128xf32>
    %73 = tpu.matmul %71, %72, %cst_30 {dimension_numbers = #tpu.dot_dimension_numbers<[1], [0], [0], [1], [0, 0, 1, 1], [], []>} : vector<8x128xbf16>, vector<128x128xbf16>, vector<8x128xf32> -> vector<8x128xf32>
    %74 = arith.addf %56, %73 : vector<8x128xf32>
    %c4_i32 = arith.constant 4 : i32
    %75 = arith.truncf %74 : vector<8x128xf32> to vector<8x128xbf16>
    %c0_31 = arith.constant 0 : index
    %c0_32 = arith.constant 0 : index
    %76 = vector.load %arg3[%c0_31, %c0_32] : memref<128x128xbf16, #tpu.memory_space<vmem>>, vector<128x128xbf16>
    %cst_33 = arith.constant dense<0.000000e+00> : vector<8x128xf32>
    %77 = tpu.matmul %75, %76, %cst_33 {dimension_numbers = #tpu.dot_dimension_numbers<[1], [0], [0], [1], [0, 0, 1, 1], [], []>} : vector<8x128xbf16>, vector<128x128xbf16>, vector<8x128xf32> -> vector<8x128xf32>
    %c1 = arith.constant 1 : index
    %c0_34 = arith.constant 0 : index
    %78 = vector.load %arg5[%c1, %c0_34] : memref<3x128xf32, #tpu.memory_space<vmem>>, vector<1x128xf32>
    %79 = vector.broadcast %78 : vector<1x128xf32> to vector<8x128xf32>
    %80 = arith.addf %77, %79 : vector<8x128xf32>
    %81 = vector.extract_strided_slice %80 {offsets = [0, 0], sizes = [8, 64], strides = [1, 1]} : vector<8x128xf32> to vector<8x64xf32>
    %82 = vector.extract_strided_slice %80 {offsets = [0, 64], sizes = [8, 64], strides = [1, 1]} : vector<8x128xf32> to vector<8x64xf32>
    %83 = arith.negf %82 : vector<8x64xf32>
    %84 = math.exp %83 : vector<8x64xf32>
    %cst_35 = arith.constant 1.000000e+00 : f32
    %85 = vector.broadcast %cst_35 : f32 to vector<8x64xf32>
    %86 = arith.addf %85, %84 : vector<8x64xf32>
    %87 = arith.divf %85, %86 : vector<8x64xf32>
    %88 = arith.mulf %82, %87 : vector<8x64xf32>
    %89 = arith.mulf %88, %81 : vector<8x64xf32>
    %90 = arith.truncf %89 : vector<8x64xf32> to vector<8x64xbf16>
    %c0_36 = arith.constant 0 : index
    %c0_37 = arith.constant 0 : index
    %91 = vector.load %arg4[%c0_36, %c0_37] : memref<64x128xbf16, #tpu.memory_space<vmem>>, vector<64x128xbf16>
    %cst_38 = arith.constant dense<0.000000e+00> : vector<8x128xf32>
    %92 = tpu.matmul %90, %91, %cst_38 {dimension_numbers = #tpu.dot_dimension_numbers<[1], [0], [0], [1], [0, 0, 1, 1], [], []>} : vector<8x64xbf16>, vector<64x128xbf16>, vector<8x128xf32> -> vector<8x128xf32>
    %c2 = arith.constant 2 : index
    %c0_39 = arith.constant 0 : index
    %93 = vector.load %arg5[%c2, %c0_39] : memref<3x128xf32, #tpu.memory_space<vmem>>, vector<1x128xf32>
    %94 = vector.broadcast %93 : vector<1x128xf32> to vector<8x128xf32>
    %95 = arith.addf %92, %94 : vector<8x128xf32>
    %c0_40 = arith.constant 0 : index
    %c0_41 = arith.constant 0 : index
    %96 = vector.load %arg6[%c0_40, %c0_41] : memref<8x128xf32, #tpu.memory_space<vmem>>, vector<8x128xf32>
    tpu.vector_store %arg6[%c0_40, %c0_41], %95 {strides = array<i32>} : memref<8x128xf32, #tpu.memory_space<vmem>>, vector<8x128xf32>,
    return
  }
}

</mosaic_0001>

<bundles_post_ra>
// kernel: hms_forward.1
= control target key start
LH: loop header
LB: loop body
LE: loop exit
PB: predicated region body
PF: predicated region fallthrough
CT: control target
= control target key end

     0   :  { %v3224_v24 = vmov 0.0   ;;  %vm2447_vm0 = vmmov 0   ;;  %s2448_s17 = smov 64   ;;  %vm1552_vm1 = vcmask 523264   ;;  %s3217_s1 = inlined_call_operand.vmem [shape: bf16[128,128], index: 1, kind: input, shape index: {}]   ;;  %s3218_s0 = inlined_call_operand.vmem [shape: bf16[4,128,128], index: 0, kind: input, shape index: {}]   ;;  %s3219_s5 = inlined_call_operand.vmem [shape: f32[3,128], index: 5, kind: input, shape index: {}]   ;;  %s3220_s2 = inlined_call_operand.vmem [shape: bf16[4,8,128], index: 2, kind: input, shape index: {}]   ;;  %s3221_s3 = inlined_call_operand.vmem [shape: bf16[128,128], index: 3, kind: input, shape index: {}]   ;;  %s3222_s4 = inlined_call_operand.vmem [shape: bf16[64,128], index: 4, kind: input, shape index: {}]   ;;  %s3223_s6 = inlined_call_operand.vmem [shape: f32[8,128], index: 6, kind: output, shape index: {}]  }
   0x1   :  { %v2487_v0 = vld [vmem:[%s3217_s1 + $0x38] sm:$0xff]   ;;  %v2492_v1 = vld [vmem:[%s3217_s1 + $0x30] sm:$0xff]   ;;  %v2503_v2 = vld [vmem:[%s3217_s1 + $0x28] sm:$0xff]  }
   0x2   :  { %3246 = vst [vmem:[#allocation2_spill] sm:$0xff] %v2487_v0  ;;  %3247 = vst [vmem:[#allocation3_spill] sm:$0xff] %v2492_v1  ;;  %1919 = vmatprep.subr.bf16.mxu1 %v2487_v0  ;;  %1887 = vmatprep.subr.bf16.mxu0 %v2487_v0  ;;  %v2510_v3 = vld [vmem:[%s3217_s1 + $0x20] sm:$0xff]   ;;  %v2527_v6 = vld [vmem:[%s3217_s1 + $0x18] sm:$0xff]  }
   0x3   :  { %1920 = vmatpush3.bf16.msra.mxu1 %v2487_v0  ;;  %1888 = vmatpush3.bf16.msra.mxu0 %v2487_v0  ;;  %3248 = vst [vmem:[#allocation4_spill] sm:$0xff] %v2503_v2  ;;  %3249 = vst [vmem:[#allocation5_spill] sm:$0xff] %v2510_v3  ;;  %v2138_v4 = vld [vmem:[%s3218_s0 + $0x40] sm:$0xff]   ;;  %v2536_v7 = vld [vmem:[%s3217_s1 + $0x10] sm:$0xff]  }
   0x4   :  { %1921 = vmatprep.subr.bf16.mxu1 %v2492_v1  ;;  %1889 = vmatprep.subr.bf16.mxu0 %v2492_v1  ;;  %v2139_v5 = vld [vmem:[%s3218_s0] sm:$0xff]   ;;  %3250 = vst [vmem:[#allocation6_spill] sm:$0xff] %v2527_v6  ;;  %3251 = vst [vmem:[#allocation7_spill] sm:$0xff] %v2536_v7  ;;  %v2545_v8 = vld [vmem:[%s3217_s1 + $0x8] sm:$0xff]  }
   0x5   :  { %1935 = vmatprep.mubr.bf16.mxu1 %v2138_v4  ;;  %1903 = vmatprep.mubr.bf16.mxu0 %v2139_v5  ;;  %3252 = vst [vmem:[#allocation8_spill] sm:$0xff] %v2545_v8  ;;  %v2554_v9 = vld [vmem:[%s3217_s1] sm:$0xff]   ;;  %v2140_v10 = vld [vmem:[%s3218_s0 + $0x48] sm:$0xff]   ;;  %v2142_v12 = vld [vmem:[%s3218_s0 + $0x50] sm:$0xff]  }
   0x6   :  { %3253 = vst [vmem:[#allocation9_spill] sm:$0xff] %v2554_v9  ;;  %v2141_v11 = vld [vmem:[%s3218_s0 + $0x8] sm:$0xff]   ;;  %v2143_v13 = vld [vmem:[%s3218_s0 + $0x10] sm:$0xff]   ;;  %v2144_v14 = vld [vmem:[%s3218_s0 + $0x58] sm:$0xff]  }
   0x7   :  { %1922 = vmatpush3.bf16.msra.mxu1 %v2492_v1  ;;  %1890 = vmatpush3.bf16.msra.mxu0 %v2492_v1  ;;  %v2145_v15 = vld [vmem:[%s3218_s0 + $0x18] sm:$0xff]   ;;  %v2146_v16 = vld [vmem:[%s3218_s0 + $0x60] sm:$0xff]   ;;  %v2148_v18 = vld [vmem:[%s3218_s0 + $0x68] sm:$0xff]  }
   0x8   :  { %1923 = vmatprep.subr.bf16.mxu1 %v2503_v2  ;;  %1891 = vmatprep.subr.bf16.mxu0 %v2503_v2  ;;  %v2147_v17 = vld [vmem:[%s3218_s0 + $0x20] sm:$0xff]   ;;  %v2149_v19 = vld [vmem:[%s3218_s0 + $0x28] sm:$0xff]   ;;  %v2150_v20 = vld [vmem:[%s3218_s0 + $0x70] sm:$0xff]  }
   0x9   :  { %v2151_v21 = vld [vmem:[%s3218_s0 + $0x30] sm:$0xff]   ;;  %v2152_v22 = vld [vmem:[%s3218_s0 + $0x78] sm:$0xff]   ;;  %v2619_v41 = vld [vmem:[%s3219_s5] ss:$0 sm:$0xff] }
   0xa   :  { %v2153_v23 = vld [vmem:[%s3218_s0 + $0x38] sm:$0xff]   ;;  %3254 = vst [vmem:[#allocation10_spill] sm:$0xff] %v2619_v41 }
   0xb   :  { %1924 = vmatpush3.bf16.msra.mxu1 %v2503_v2  ;;  %1892 = vmatpush3.bf16.msra.mxu0 %v2503_v2 }
   0xc   :  { %1925 = vmatprep.subr.bf16.mxu1 %v2510_v3  ;;  %1893 = vmatprep.subr.bf16.mxu0 %v2510_v3 }
   0xf   :  { %1926 = vmatpush3.bf16.msra.mxu1 %v2510_v3  ;;  %1894 = vmatpush3.bf16.msra.mxu0 %v2510_v3 }
  0x10   :  { %1927 = vmatprep.subr.bf16.mxu1 %v2527_v6  ;;  %1895 = vmatprep.subr.bf16.mxu0 %v2527_v6 }
  0x13   :  { %1928 = vmatpush3.bf16.msra.mxu1 %v2527_v6  ;;  %1896 = vmatpush3.bf16.msra.mxu0 %v2527_v6 }
  0x14   :  { %1929 = vmatprep.subr.bf16.mxu1 %v2536_v7  ;;  %1897 = vmatprep.subr.bf16.mxu0 %v2536_v7 }
  0x17   :  { %1930 = vmatpush3.bf16.msra.mxu1 %v2536_v7  ;;  %1898 = vmatpush3.bf16.msra.mxu0 %v2536_v7 }
  0x18   :  { %1931 = vmatprep.subr.bf16.mxu1 %v2545_v8  ;;  %1899 = vmatprep.subr.bf16.mxu0 %v2545_v8 }
  0x1b   :  { %1932 = vmatpush3.bf16.msra.mxu1 %v2545_v8  ;;  %1900 = vmatpush3.bf16.msra.mxu0 %v2545_v8 }
  0x1c   :  { %1933 = vmatprep.subr.bf16.mxu1 %v2554_v9  ;;  %1901 = vmatprep.subr.bf16.mxu0 %v2554_v9 }
  0x1f   :  { %1934 = vmatpush3.bf16.msra.mxu1 %v2554_v9  ;;  %1902 = vmatpush3.bf16.msra.mxu0 %v2554_v9 }
  0x20   :  { %1951 = vmatprep.subr.bf16.mxu0 %v3224_v24  ;;  %1971 = vmatprep.subr.bf16.mxu1 %v3224_v24 }
  0x22   :  { %1936 = vmatmul.mubr.bf16.vlgmr.msra.gmra.mxu1 %v2140_v10  ;;  %1904 = vmatmul.mubr.bf16.vlgmr.msra.gmra.mxu0 %v2141_v11 }
  0x23   :  { %1939 = vmatprep.mubr.bf16.mxu1 %v2142_v12  ;;  %1907 = vmatprep.mubr.bf16.mxu0 %v2143_v13 }
  0x2a   :  { %1940 = vmatmul.mubr.bf16.gmra.mxu1 %v2144_v14  ;;  %1908 = vmatmul.mubr.bf16.gmra.mxu0 %v2145_v15 }
  0x2b   :  { %1943 = vmatprep.mubr.bf16.mxu1 %v2146_v16  ;;  %1911 = vmatprep.mubr.bf16.mxu0 %v2147_v17 }
  0x32   :  { %1944 = vmatmul.mubr.bf16.gmra.mxu1 %v2148_v18  ;;  %1912 = vmatmul.mubr.bf16.gmra.mxu0 %v2149_v19 }
  0x33   :  { %1947 = vmatprep.mubr.bf16.mxu1 %v2150_v20  ;;  %1915 = vmatprep.mubr.bf16.mxu0 %v2151_v21 }
  0x3a   :  { %1948 = vmatmul.mubr.bf16.gmra.mxu1 %v2152_v22  ;;  %1916 = vmatmul.mubr.bf16.gmra.mxu0 %v2153_v23 }
  0x3b   :  { %1967 = vmatprep.mubr.msk.bf16.mxu0 %vm2447_vm0, %v3224_v24  ;;  %1987 = vmatprep.mubr.msk.bf16.mxu1 %vm2447_vm0, %v3224_v24 }
  0xe2   :  { %v1937_v25 = vpop.f32.mrf.mxu1  ;;  %v1905_v26 = vpop.f32.mrf.mxu0 }
  0xe3   :  { %v2622_v44 = vadd.f32 %v1937_v25, %v2619_v41  ;;  %v2627_v46 = vadd.f32 %v1905_v26, %v2619_v41 }
  0xe4   :  { %v474_v27 = vpop.f32.mrf.mxu1  ;;  %v191_v28 = vpop.f32.mrf.mxu0 }
  0xe5   :  { %v2630_v48 = vadd.f32 %v2619_v41, %v474_v27  ;;  %v2633_v50 = vadd.f32 %v2619_v41, %v191_v28  ;;  %v1660_v51 = vmul.f32 -1.442695, %v2622_v44  ;;  %v1620_v53 = vmul.f32 -1.442695, %v2627_v46 }
  0xe6   :  { %v1938_v29 = vpop.f32.mrf.mxu1  ;;  %v1906_v30 = vpop.f32.mrf.mxu0 }
  0xe7   :  { %3255 = vst [vmem:[#allocation11_spill] sm:$0xff] %v2630_v48  ;;  %v2637_v52 = vadd.f32 %v1938_v29, %v2619_v41  ;;  %v2641_v54 = vadd.f32 %v1906_v30, %v2619_v41  ;;  %v1658_v56 = vmul.f32 -1.442695, %v2630_v48  ;;  %v1618_v59 = vmul.f32 -1.442695, %v2633_v50 }
  0xe8   :  { %v477_v31 = vpop.f32.mrf.mxu1  ;;  %v194_v32 = vpop.f32.mrf.mxu0  ;;  %2182 = vpow2.f32 %v1660_v51 }
  0xe9   :  { %v2645_v57 = vadd.f32 %v2619_v41, %v477_v31  ;;  %v2651_v60 = vadd.f32 %v2619_v41, %v194_v32  ;;  %v1661_v61 = vmul.f32 -1.442695, %v2637_v52  ;;  %2184 = vpow2.f32 %v1620_v53 }
  0xea   :  { %v1941_v33 = vpop.f32.mrf.mxu1  ;;  %v1909_v34 = vpop.f32.mrf.mxu0  ;;  %v1621_v63 = vmul.f32 -1.442695, %v2641_v54  ;;  %2186 = vpow2.f32 %v1658_v56 }
  0xeb   :  { %3256 = vst [vmem:[#allocation12_spill] sm:$0xff] %v2645_v57  ;;  %v2655_v62 = vadd.f32 %v1941_v33, %v2619_v41  ;;  %v2659_v4 = vadd.f32 %v1909_v34, %v2619_v41  ;;  %v1659_v10 = vmul.f32 -1.442695, %v2645_v57  ;;  %2188 = vpow2.f32 %v1618_v59 }
  0xec   :  { %v490_v35 = vpop.f32.mrf.mxu1  ;;  %v207_v36 = vpop.f32.mrf.mxu0  ;;  %v1619_v13 = vmul.f32 -1.442695, %v2651_v60  ;;  %2190 = vpow2.f32 %v1661_v61 }
  0xed   :  { %v2663_v11 = vadd.f32 %v2619_v41, %v490_v35  ;;  %v2667_v14 = vadd.f32 %v2619_v41, %v207_v36  ;;  %v1664_v15 = vmul.f32 -1.442695, %v2655_v62  ;;  %2192 = vpow2.f32 %v1621_v63 }
  0xee   :  { %v1942_v37 = vpop.f32.mrf.mxu1  ;;  %v2610_v38 = vpop.f32.mrf.mxu0  ;;  %v1624_v17 = vmul.f32 -1.442695, %v2659_v4  ;;  %2194 = vpow2.f32 %v1659_v10 }
  0xef   :  { %v2671_v16 = vadd.f32 %v1942_v37, %v2619_v41  ;;  %v1662_v20 = vmul.f32 -1.442695, %v2663_v11  ;;  %2196 = vpow2.f32 %v1619_v13  ;;  %v1622_v23 = vmul.f32 -1.442695, %v2667_v14 }
  0xf0   :  { %v2612_v39 = vpop.f32.mrf.mxu1  ;;  %v2614_v40 = vpop.f32.mrf.mxu0  ;;  %2198 = vpow2.f32 %v1664_v15 }
  0xf1   :  { %v1665_v26 = vmul.f32 -1.442695, %v2671_v16  ;;  %2200 = vpow2.f32 %v1624_v17 }
  0xf2   :  { %v1945_v42 = vpop.f32.mrf.mxu1  ;;  %v1913_v43 = vpop.f32.mrf.mxu0  ;;  %2202 = vpow2.f32 %v1662_v20 }
  0xf3   :  { %v2675_v18 = vadd.f32 %v1913_v43, %v2619_v41  ;;  %v2679_v21 = vadd.f32 %v1945_v42, %v2619_v41  ;;  %2204 = vpow2.f32 %v1622_v23 }
  0xf4   :  { %v2624_v45 = vpop.f32.mrf.mxu1  ;;  %v223_v47 = vpop.f32.mrf.mxu0  ;;  %2206 = vpow2.f32 %v1665_v26 }
  0xf5   :  { %v2683_v25 = vadd.f32 %v2619_v41, %v223_v47  ;;  %v1628_v28 = vmul.f32 -1.442695, %v2675_v18  ;;  %v1668_v31 = vmul.f32 -1.442695, %v2679_v21  ;;  %v2705_v42 = vpop.eup %2182 }
  0xf6   :  { %v1946_v49 = vpop.f32.mrf.mxu1  ;;  %v1914_v55 = vpop.f32.mrf.mxu0 }
  0xf7   :  { %v2687_v27 = vadd.f32 %v1914_v55, %v2619_v41  ;;  %v2691_v29 = vadd.f32 %v1946_v49, %v2619_v41  ;;  %v1626_v34 = vmul.f32 -1.442695, %v2683_v25  ;;  %2208 = vpow2.f32 %v1628_v28  ;;  %v2185_v51 = vpop.eup %2184 }
  0xf8   :  { %v2647_v58 = vpop.f32.mrf.mxu1  ;;  %v226_v5 = vpop.f32.mrf.mxu0  ;;  %2210 = vpow2.f32 %v1668_v31 }
  0xf9   :  { %v2695_v32 = vadd.f32 %v2619_v41, %v226_v5  ;;  %v1629_v36 = vmul.f32 -1.442695, %v2687_v27  ;;  %v1669_v43 = vmul.f32 -1.442695, %v2691_v29  ;;  %v2715_v59 = vpop.eup %2186  ;;  %2212 = vpow2.f32 %v1626_v34 }
  0xfa   :  { %v1949_v12 = vpop.f32.mrf.mxu1  ;;  %v1917_v19 = vpop.f32.mrf.mxu0  ;;  %v2743_v28 = vadd.f32 %v2619_v41, %v2647_v58 }
  0xfb   :  { %v2699_v35 = vadd.f32 %v1949_v12, %v2619_v41  ;;  %v2703_v37 = vadd.f32 %v1917_v19, %v2619_v41  ;;  %v1627_v53 = vmul.f32 -1.442695, %v2695_v32  ;;  %v2721_v10 = vpop.eup %2188  ;;  %2214 = vpow2.f32 %v1629_v36 }
  0xfc   :  { %v522_v22 = vpop.f32.mrf.mxu1  ;;  %v239_v30 = vpop.f32.mrf.mxu0  ;;  %2216 = vpow2.f32 %v1669_v43  ;;  %v2757_v43 = vadd.f32 %v2619_v41, %v2624_v45  ;;  %v1667_v45 = vmul.f32 -1.442695, %v2743_v28 }
  0xfd   :  { %v2709_v47 = vadd.f32 %v2619_v41, %v522_v22  ;;  %v2713_v55 = vadd.f32 %v2619_v41, %v239_v30  ;;  %v1672_v61 = vmul.f32 -1.442695, %v2699_v35  ;;  %v1632_v12 = vmul.f32 -1.442695, %v2703_v37  ;;  %v2727_v15 = vpop.eup %2190 }
  0xfe   :  { %v1950_v33 = vpop.f32.mrf.mxu1  ;;  %v1918_v49 = vpop.f32.mrf.mxu0  ;;  %2218 = vpow2.f32 %v1627_v53  ;;  %v2764_v53 = vadd.f32 %v2619_v41, %v2612_v39  ;;  %v1666_v39 = vmul.f32 -1.442695, %v2757_v43 }
  0xff   :  { %v2719_v63 = vadd.f32 %v1950_v33, %v2619_v41  ;;  %v2725_v13 = vadd.f32 %v1918_v49, %v2619_v41  ;;  %v1670_v17 = vmul.f32 -1.442695, %v2709_v47  ;;  %v2733_v20 = vpop.eup %2192  ;;  %v1630_v22 = vmul.f32 -1.442695, %v2713_v55 }
 0x100   :  { %v525_v56 = vpop.f32.mrf.mxu1  ;;  %v242_v5 = vpop.f32.mrf.mxu0  ;;  %2220 = vpow2.f32 %v1672_v61  ;;  %v2750_v33 = vadd.f32 %v2610_v38, %v2619_v41  ;;  %v2771_v61 = vadd.f32 %v2619_v41, %v2614_v40  ;;  %v1663_v24 = vmul.f32 -1.442695, %v2764_v53 }
 0x101   :  { %v2731_v19 = vadd.f32 %v2619_v41, %v525_v56  ;;  %v2737_v23 = vadd.f32 %v2619_v41, %v242_v5  ;;  %v2739_v26 = vpop.eup %2194  ;;  %v1673_v30 = vmul.f32 -1.442695, %v2719_v63  ;;  %2222 = vpow2.f32 %v1632_v12 }
 0x102   :  { %v2746_v31 = vpop.eup %2196  ;;  %v1633_v34 = vmul.f32 -1.442695, %v2725_v13  ;;  %2224 = vpow2.f32 %v1670_v17  ;;  %v1625_v12 = vmul.f32 -1.442695, %v2750_v33  ;;  %v1623_v40 = vmul.f32 -1.442695, %v2771_v61 }
 0x103   :  { %v2753_v36 = vpop.eup %2198  ;;  %v1671_v58 = vmul.f32 -1.442695, %v2731_v19  ;;  %2226 = vpow2.f32 %v1630_v22  ;;  %v1631_v38 = vmul.f32 -1.442695, %v2737_v23 }
 0x104   :  { %v2760_v49 = vpop.eup %2200  ;;  %2228 = vpow2.f32 %v1673_v30  ;;  %v304_v30 = vadd.f32 1.0, %v2185_v51 }
 0x105   :  { %v2767_v56 = vpop.eup %2202  ;;  %2230 = vpow2.f32 %v1633_v34 }
 0x106   :  { %v2774_v5 = vpop.eup %2204  ;;  %2232 = vpow2.f32 %v1671_v58 }
 0x107   :  { %v2777_v17 = vpop.eup %2206  ;;  %2234 = vpow2.f32 %v1631_v38 }
 0x108   :  { %v2209_v22 = vpop.eup %2208  ;;  %2236 = vpow2.f32 %v1667_v45 }
 0x109   :  { %v2211_v9 = vpop.eup %2210  ;;  %2238 = vpow2.f32 %v1625_v12  ;;  %v312_v7 = vadd.f32 1.0, %v2209_v22 }
 0x10a   :  { %v2213_v41 = vpop.eup %2212  ;;  %2240 = vpow2.f32 %v1666_v39  ;;  %v595_v57 = vadd.f32 1.0, %v2211_v9 }
 0x10b   :  { %v2215_v8 = vpop.eup %2214  ;;  %2242 = vpow2.f32 %v1663_v24 }
 0x10c   :  { %v2217_v34 = vpop.eup %2216  ;;  %v313_v6 = vadd.f32 1.0, %v2215_v8  ;;  %2244 = vpow2.f32 %v1623_v40 }
 0x10d   :  { %v2219_v3 = vpop.eup %2218  ;;  %2246 = vrcp.f32 %v304_v30  ;;  %v596_v30 = vadd.f32 1.0, %v2217_v34 }
 0x10e   :  { %v2221_v58 = vpop.eup %2220  ;;  %2248 = vrcp.f32 %v312_v7 }
 0x10f   :  { %v2223_v2 = vpop.eup %2222  ;;  %v599_v38 = vadd.f32 1.0, %v2221_v58  ;;  %2250 = vrcp.f32 %v313_v6 }
 0x110   :  { %v2225_v1 = vpop.eup %2224  ;;  %v316_v0 = vadd.f32 1.0, %v2223_v2 }
 0x111   :  { %v2227_v45 = vpop.eup %2226  ;;  %2252 = vrcp.f32 %v599_v38  ;;  %v597_v51 = vadd.f32 1.0, %v2225_v1  ;;  %v310_v38 = vadd.f32 1.0, %v2213_v41  ;;  %v592_v41 = vadd.f32 1.0, %v2777_v17 }
 0x112   :  { %v2229_v12 = vpop.eup %2228  ;;  %2254 = vrcp.f32 %v316_v0  ;;  %v314_v22 = vadd.f32 1.0, %v2227_v45  ;;  %v311_v0 = vadd.f32 1.0, %v2219_v3 }
 0x113   :  { %v2231_v39 = vpop.eup %2230  ;;  %2256 = vrcp.f32 %v597_v51  ;;  %v600_v24 = vadd.f32 1.0, %v2229_v12 }
 0x114   :  { %v2233_v8 = vpop.eup %2232  ;;  %2258 = vrcp.f32 %v314_v22  ;;  %v317_v40 = vadd.f32 1.0, %v2231_v39  ;;  %v308_v22 = vadd.f32 1.0, %v2760_v49 }
 0x115   :  { %v2235_v48 = vpop.eup %2234  ;;  %2260 = vrcp.f32 %v600_v24  ;;  %v598_v7 = vadd.f32 1.0, %v2233_v8  ;;  %v591_v8 = vadd.f32 1.0, %v2753_v36  ;;  %v589_v36 = vadd.f32 1.0, %v2767_v56 }
 0x116   :  { %v2237_v58 = vpop.eup %2236  ;;  %2262 = vrcp.f32 %v317_v40  ;;  %v315_v2 = vadd.f32 1.0, %v2235_v48  ;;  %v587_v56 = vadd.f32 1.0, %v2705_v42  ;;  %v3257_v42 = vmov 0.0  }
 0x117   :  { %v2239_v6 = vpop.eup %2238  ;;  %2264 = vrcp.f32 %v598_v7  ;;  %v594_v51 = vadd.f32 1.0, %v2237_v58 }
 0x118   :  { %v2241_v1 = vpop.eup %2240  ;;  %2266 = vrcp.f32 %v315_v2  ;;  %v309_v24 = vadd.f32 1.0, %v2239_v6  ;;  %v305_v6 = vadd.f32 1.0, %v2733_v20  ;;  %v588_v20 = vadd.f32 1.0, %v2727_v15 }
 0x119   :  { %v2243_v45 = vpop.eup %2242  ;;  %2268 = vrcp.f32 %v596_v30  ;;  %v593_v39 = vadd.f32 1.0, %v2241_v1  ;;  %v306_v30 = vadd.f32 1.0, %v2774_v5  ;;  %v303_v15 = vadd.f32 1.0, %v2746_v31 }
 0x11a   :  { %v2245_v12 = vpop.eup %2244  ;;  %2270 = vrcp.f32 %v595_v57  ;;  %v590_v58 = vadd.f32 1.0, %v2243_v45 }
 0x11b   :  { %v2783_v34 = vpop.eup %2246  ;;  %2272 = vrcp.f32 %v310_v38  ;;  %v307_v49 = vadd.f32 1.0, %v2245_v12 }
 0x11c   :  { %v2249_v9 = vpop.eup %2248  ;;  %2274 = vrcp.f32 %v311_v0 }
 0x11d   :  { %v2251_v48 = vpop.eup %2250  ;;  %2276 = vrcp.f32 %v594_v51 }
 0x11e   :  { %v2253_v3 = vpop.eup %2252  ;;  %2278 = vrcp.f32 %v308_v22 }
 0x11f   :  { %v2255_v40 = vpop.eup %2254  ;;  %2280 = vrcp.f32 %v593_v39  ;;  %v647_v1 = vmul.f32 %v2253_v3, %v2699_v35  ;;  %v360_v3 = vmul.f32 %v2249_v9, %v2675_v18  ;;  %v585_v18 = vadd.f32 1.0, %v2715_v59 }
 0x120   :  { %v2257_v57 = vpop.eup %2256  ;;  %2282 = vrcp.f32 %v309_v24  ;;  %v364_v17 = vmul.f32 %v2255_v40, %v2703_v37 }
 0x121   :  { %v2259_v7 = vpop.eup %2258  ;;  %2284 = vrcp.f32 %v592_v41  ;;  %v302_v41 = vadd.f32 1.0, %v2721_v10 }
 0x122   :  { %v2261_v2 = vpop.eup %2260  ;;  %2286 = vrcp.f32 %v591_v8  ;;  %v362_v51 = vmul.f32 %v2259_v7, %v2713_v55  ;;  %v645_v55 = vmul.f32 %v2257_v57, %v2709_v47 }
 0x123   :  { %v2263_v38 = vpop.eup %2262  ;;  %2288 = vrcp.f32 %v306_v30  ;;  %v648_v5 = vmul.f32 %v2261_v2, %v2719_v63 }
 0x124   :  { %v2265_v0 = vpop.eup %2264  ;;  %2290 = vrcp.f32 %v307_v49  ;;  %v365_v45 = vmul.f32 %v2263_v38, %v2725_v13 }
 0x125   :  { %v2267_v12 = vpop.eup %2266  ;;  %2292 = vrcp.f32 %v590_v58  ;;  %v658_v22 = vpack.c.bf16 %v648_v5, %v647_v1  ;;  %v646_v37 = vmul.f32 %v2265_v0, %v2731_v19  ;;  %v361_v19 = vmul.f32 %v2251_v48, %v2687_v27 }
 0x126   :  { %v2269_v39 = vpop.eup %2268  ;;  %2294 = vrcp.f32 %v305_v6  ;;  %v374_v35 = vpack.c.bf16 %v365_v45, %v364_v17  ;;  %v363_v63 = vmul.f32 %v2267_v12, %v2737_v23  ;;  %v586_v23 = vadd.f32 1.0, %v2739_v26 }
 0x127   :  { %v2271_v24 = vpop.eup %2270  ;;  %2296 = vrcp.f32 %v589_v36  ;;  %1952 = vmatpush3.bf16.msra.mxu0 %v658_v22  ;;  %v644_v10 = vmul.f32 %v2269_v39, %v2691_v29  ;;  %v657_v30 = vpack.c.bf16 %v646_v37, %v645_v55  ;;  %v372_v57 = vpack.c.bf16 %v361_v19, %v360_v3  ;;  %v2154_v3 = vld [vmem:[%s3218_s0 + $0x80] sm:$0xff]   ;;  %v3261_v19 = vld [vmem:[#allocation3_spill] sm:$0xff] }
 0x128   :  { %v2273_v13 = vpop.eup %2272  ;;  %v373_v8 = vpack.c.bf16 %v363_v63, %v362_v51  ;;  %1972 = vmatpush3.bf16.msra.mxu1 %v374_v35  ;;  %1953 = vmatprep.subr.bf16.mxu0 %v3257_v42  ;;  %2298 = vrcp.f32 %v588_v20  ;;  %v643_v27 = vmul.f32 %v2271_v24, %v2679_v21  ;;  %v3258_v24 = vld [vmem:[#allocation12_spill] sm:$0xff] }
 0x129   :  { %v2275_v40 = vpop.eup %2274  ;;  %1973 = vmatprep.subr.bf16.mxu1 %v3257_v42  ;;  %2300 = vrcp.f32 %v587_v56  ;;  %v358_v48 = vmul.f32 %v2273_v13, %v2683_v25 }
 0x12a   :  { %v2277_v47 = vpop.eup %2276  ;;  %2302 = vrcp.f32 %v302_v41  ;;  %v359_v26 = vmul.f32 %v2275_v40, %v2695_v32  ;;  %v656_v49 = vpack.c.bf16 %v644_v10, %v643_v27  ;;  %v3263_v40 = vld [vmem:[#allocation5_spill] sm:$0xff]  ;;  %v3265_v10 = vld [vmem:[#allocation7_spill] sm:$0xff] }
 0x12b   :  { %v2279_v31 = vpop.eup %2278  ;;  %1954 = vmatpush3.bf16.msra.mxu0 %v657_v30  ;;  %2304 = vrcp.f32 %v303_v15  ;;  %v642_v7 = vmul.f32 %v2277_v47, %v2743_v28  ;;  %v366_v15 = vld [vmem:[%s3220_s2] sm:$0xf]  ;;  %v3266_v30 = vld [vmem:[#allocation8_spill] sm:$0xff]  ;;  %v3267_v47 = vld [vmem:[#allocation9_spill] sm:$0xff] }
 0x12c   :  { %v2281_v9 = vpop.eup %2280  ;;  %1974 = vmatpush3.bf16.msra.mxu1 %v373_v8  ;;  %1955 = vmatprep.subr.bf16.mxu0 %v3257_v42  ;;  %2306 = vrcp.f32 %v586_v23  ;;  %v356_v2 = vmul.f32 %v2279_v31, %v2659_v4  ;;  %v371_v6 = vpack.c.bf16 %v359_v26, %v358_v48  ;;  %v3262_v8 = vld [vmem:[#allocation4_spill] sm:$0xff]  ;;  %v3264_v23 = vld [vmem:[#allocation6_spill] sm:$0xff]  ;;  %v2155_v31 = vld [vmem:[%s3218_s0 + $0x88] sm:$0xff]  }
 0x12d   :  { %v2283_v29 = vpop.eup %2282  ;;  %1975 = vmatprep.subr.bf16.mxu1 %v3257_v42  ;;  %2308 = vrcp.f32 %v585_v18  ;;  %v641_v58 = vmul.f32 %v2281_v9, %v2757_v43  ;;  %v2156_v18 = vld [vmem:[%s3218_s0 + $0x90] sm:$0xff]   ;;  %v2442_v27 = vld [vmem:[%s3217_s1 + $0x38] sm:$0xff]   ;;  %v2444_v26 = vld [vmem:[%s3217_s1 + $0x28] sm:$0xff]  }
 0x12e   :  { %v2285_v59 = vpop.eup %2284  ;;  %v357_v32 = vmul.f32 %v2283_v29, %v2750_v33  ;;  %v2443_v9 = vld [vmem:[%s3217_s1 + $0x30] sm:$0xff]   ;;  %v2157_v48 = vld [vmem:[%s3218_s0 + $0x98] sm:$0xff]   ;;  %v2159_v29 = vld [vmem:[%s3218_s0 + $0xa8] sm:$0xff]  }
 0x12f   :  { %v2287_v21 = vpop.eup %2286  ;;  %1956 = vmatpush3.bf16.msra.mxu0 %v656_v49  ;;  %v640_v28 = vmul.f32 %v2285_v59, %v2671_v16  ;;  %v655_v38 = vpack.c.bf16 %v642_v7, %v641_v58  ;;  %v2160_v49 = vld [vmem:[%s3218_s0 + $0xb0] sm:$0xff]   ;;  %v2161_v7 = vld [vmem:[%s3218_s0 + $0xb8] sm:$0xff]   ;;  %v2162_v59 = vld [vmem:[%s3218_s0 + $0xc0] sm:$0xff]  }
 0x130   :  { %v2289_v25 = vpop.eup %2288  ;;  %1976 = vmatpush3.bf16.msra.mxu1 %v372_v57  ;;  %1957 = vmatprep.subr.bf16.mxu0 %v3257_v42  ;;  %v639_v43 = vmul.f32 %v2287_v21, %v2655_v62  ;;  %v370_v0 = vpack.c.bf16 %v357_v32, %v356_v2  ;;  %v2158_v57 = vld [vmem:[%s3218_s0 + $0xa0] sm:$0xff]   ;;  %v2163_v21 = vld [vmem:[%s3218_s0 + $0xc8] sm:$0xff]   ;;  %v2164_v58 = vld [vmem:[%s3218_s0 + $0xd0] sm:$0xff]  }
 0x131   :  { %v2291_v17 = vpop.eup %2290  ;;  %1977 = vmatprep.subr.bf16.mxu1 %v3257_v42  ;;  %v354_v4 = vmul.f32 %v2289_v25, %v2667_v14  ;;  %v352_v14 = vmul.f32 %v2783_v34, %v2627_v46  ;;  %v2165_v25 = vld [vmem:[%s3218_s0 + $0xd8] sm:$0xff]   ;;  %v2166_v2 = vld [vmem:[%s3218_s0 + $0xe0] sm:$0xff]   ;;  %v2167_v32 = vld [vmem:[%s3218_s0 + $0xe8] sm:$0xff]  }
 0x132   :  { %v2293_v36 = vpop.eup %2292  ;;  %v355_v33 = vmul.f32 %v2291_v17, %v2771_v61  ;;  %v654_v51 = vpack.c.bf16 %v640_v28, %v639_v43  ;;  %v2169_v17 = vld [vmem:[%s3218_s0 + $0xf8] sm:$0xff]  }
 0x133   :  { %v2295_v1 = vpop.eup %2294  ;;  %1958 = vmatpush3.bf16.msra.mxu0 %v655_v38  ;;  %v638_v16 = vmul.f32 %v2293_v36, %v2764_v53 }
 0x134   :  { %v2297_v5 = vpop.eup %2296  ;;  %1978 = vmatpush3.bf16.msra.mxu1 %v371_v6  ;;  %1959 = vmatprep.subr.bf16.mxu0 %v3257_v42  ;;  %v353_v22 = vmul.f32 %v2295_v1, %v2641_v54  ;;  %v369_v61 = vpack.c.bf16 %v355_v33, %v354_v4  ;;  %v2168_v6 = vld [vmem:[%s3218_s0 + $0xf0] sm:$0xff]  }
 0x135   :  { %1979 = vmatprep.subr.bf16.mxu1 %v3257_v42  ;;  %v2299_v45 = vpop.eup %2298  ;;  %v637_v20 = vmul.f32 %v2297_v5, %v2663_v11 }
 0x136   :  { %v2301_v12 = vpop.eup %2300  ;;  %v636_v53 = vmul.f32 %v2299_v45, %v2637_v52  ;;  %v368_v46 = vpack.c.bf16 %v353_v22, %v352_v14  ;;  %v3259_v52 = vld [vmem:[#allocation11_spill] sm:$0xff] }
 0x137   :  { %1960 = vmatpush3.bf16.msra.mxu0 %v654_v51  ;;  %v2303_v62 = vpop.eup %2302  ;;  %v653_v39 = vpack.c.bf16 %v638_v16, %v637_v20  ;;  %v635_v11 = vmul.f32 %v2301_v12, %v2622_v44 }
 0x138   :  { %1980 = vmatpush3.bf16.msra.mxu1 %v370_v0  ;;  %1961 = vmatprep.subr.bf16.mxu0 %v3257_v42  ;;  %v2305_v37 = vpop.eup %2304  ;;  %v350_v63 = vmul.f32 %v2303_v62, %v2633_v50  ;;  %v1674_v50 = vld [vmem:[%s3220_s2 + $0x4] sm:$0xf] }
 0x139   :  { %1981 = vmatprep.subr.bf16.mxu1 %v3257_v42  ;;  %v2307_v56 = vpop.eup %2306  ;;  %v351_v54 = vmul.f32 %v2305_v37, %v2651_v60  ;;  %v652_v34 = vpack.c.bf16 %v636_v53, %v635_v11  ;;  %v3260_v60 = vld [vmem:[#allocation2_spill] sm:$0xff] }
 0x13a   :  { %v2309_v35 = vpop.eup %2308  ;;  %v634_v41 = vmul.f32 %v2307_v56, %v3258_v24  ;;  %v3268_v56 = vld [vmem:[#allocation10_spill] sm:$0xff] }
 0x13b   :  { %1962 = vmatpush3.bf16.msra.mxu0 %v653_v39  ;;  %v633_v55 = vmul.f32 %v2309_v35, %v3259_v52  ;;  %v367_v13 = vpack.c.bf16 %v351_v54, %v350_v63 }
 0x13c   :  { %1982 = vmatpush3.bf16.msra.mxu1 %v369_v61  ;;  %1963 = vmatprep.subr.bf16.mxu0 %v3257_v42 }
 0x13d   :  { %1983 = vmatprep.subr.bf16.mxu1 %v3257_v42  ;;  %v651_v44 = vpack.c.bf16 %v634_v41, %v633_v55 }
 0x13f   :  { %1964 = vmatpush3.bf16.msra.mxu0 %v652_v34 }
 0x140   :  { %1984 = vmatpush3.bf16.msra.mxu1 %v368_v46  ;;  %1965 = vmatprep.subr.bf16.mxu0 %v3257_v42 }
 0x141   :  { %1985 = vmatprep.subr.bf16.mxu1 %v3257_v42 }
 0x143   :  { %1966 = vmatpush3.bf16.msra.mxu0 %v651_v44 }
 0x144   :  { %1986 = vmatpush3.bf16.msra.mxu1 %v367_v13  ;;  %1991 = vmatprep.subr.bf16.mxu0 %v3260_v60 }
 0x145   :  { %2023 = vmatprep.subr.bf16.mxu1 %v3257_v42 }
 0x146   :  { %1968 = vmatmul.mubr.bf16.vlgmr.msra.gmra.mxu0 %v1674_v50 }
 0x147   :  { %1988 = vmatmul.mubr.bf16.vlgmr.msra.gmra.mxu1 %v366_v15  ;;  %1992 = vmatpush3.bf16.msra.mxu0 %v3260_v60 }
 0x148   :  { %1993 = vmatprep.subr.bf16.mxu0 %v3261_v19  ;;  %2007 = vmatprep.mubr.bf16.mxu0 %v2154_v3 }
 0x149   :  { %2039 = vmatprep.mubr.msk.bf16.mxu1 %vm2447_vm0, %v3257_v42 }
 0x14b   :  { %1994 = vmatpush3.bf16.msra.mxu0 %v3261_v19 }
 0x14c   :  { %1995 = vmatprep.subr.bf16.mxu0 %v3262_v8 }
 0x14f   :  { %1996 = vmatpush3.bf16.msra.mxu0 %v3262_v8 }
 0x150   :  { %1997 = vmatprep.subr.bf16.mxu0 %v3263_v40 }
 0x153   :  { %1998 = vmatpush3.bf16.msra.mxu0 %v3263_v40 }
 0x154   :  { %1999 = vmatprep.subr.bf16.mxu0 %v3264_v23 }
 0x157   :  { %2000 = vmatpush3.bf16.msra.mxu0 %v3264_v23 }
 0x158   :  { %2001 = vmatprep.subr.bf16.mxu0 %v3265_v10 }
 0x15b   :  { %2002 = vmatpush3.bf16.msra.mxu0 %v3265_v10 }
 0x15c   :  { %2003 = vmatprep.subr.bf16.mxu0 %v3266_v30 }
 0x15f   :  { %2004 = vmatpush3.bf16.msra.mxu0 %v3266_v30 }
 0x160   :  { %2005 = vmatprep.subr.bf16.mxu0 %v3267_v47 }
 0x163   :  { %2006 = vmatpush3.bf16.msra.mxu0 %v3267_v47 }
 0x164   :  { %2043 = vmatprep.subr.bf16.mxu0 %v2442_v27 }
 0x166   :  { %2008 = vmatmul.mubr.bf16.vlgmr.msra.gmra.mxu0 %v2155_v31 }
 0x167   :  { %2044 = vmatpush3.bf16.msra.mxu0 %v2442_v27  ;;  %2011 = vmatprep.mubr.bf16.mxu0 %v2156_v18 }
 0x168   :  { %2045 = vmatprep.subr.bf16.mxu0 %v2443_v9 }
 0x16b   :  { %2046 = vmatpush3.bf16.msra.mxu0 %v2443_v9 }
 0x16c   :  { %2047 = vmatprep.subr.bf16.mxu0 %v2444_v26 }
 0x16e   :  { %2012 = vmatmul.mubr.bf16.gmra.mxu0 %v2157_v48 }
 0x16f   :  { %2048 = vmatpush3.bf16.msra.mxu0 %v2444_v26  ;;  %2015 = vmatprep.mubr.bf16.mxu0 %v2158_v57 }
 0x170   :  { %2049 = vmatprep.subr.bf16.mxu0 %v3263_v40 }
 0x173   :  { %2050 = vmatpush3.bf16.msra.mxu0 %v3263_v40 }
 0x174   :  { %2051 = vmatprep.subr.bf16.mxu0 %v3264_v23 }
 0x176   :  { %2016 = vmatmul.mubr.bf16.gmra.mxu0 %v2159_v29 }
 0x177   :  { %2052 = vmatpush3.bf16.msra.mxu0 %v3264_v23  ;;  %2019 = vmatprep.mubr.bf16.mxu0 %v2160_v49 }
 0x178   :  { %2053 = vmatprep.subr.bf16.mxu0 %v3265_v10 }
 0x17b   :  { %2054 = vmatpush3.bf16.msra.mxu0 %v3265_v10 }
 0x17c   :  { %2055 = vmatprep.subr.bf16.mxu0 %v3266_v30 }
 0x17e   :  { %2020 = vmatmul.mubr.bf16.gmra.mxu0 %v2161_v7 }
 0x17f   :  { %2056 = vmatpush3.bf16.msra.mxu0 %v3266_v30  ;;  %2059 = vmatprep.mubr.bf16.mxu0 %v2162_v59 }
 0x180   :  { %2057 = vmatprep.subr.bf16.mxu0 %v3267_v47 }
 0x183   :  { %2058 = vmatpush3.bf16.msra.mxu0 %v3267_v47 }
 0x184   :  { %2095 = vmatprep.subr.bf16.mxu0 %v3257_v42 }
 0x186   :  { %2060 = vmatmul.mubr.bf16.vlgmr.msra.gmra.mxu0 %v2163_v21 }
 0x187   :  { %2063 = vmatprep.mubr.bf16.mxu0 %v2164_v58 }
 0x18e   :  { %2064 = vmatmul.mubr.bf16.gmra.mxu0 %v2165_v25 }
 0x18f   :  { %2067 = vmatprep.mubr.bf16.mxu0 %v2166_v2 }
 0x196   :  { %2068 = vmatmul.mubr.bf16.gmra.mxu0 %v2167_v32 }
 0x197   :  { %2071 = vmatprep.mubr.bf16.mxu0 %v2168_v6 }
 0x19e   :  { %2072 = vmatmul.mubr.bf16.gmra.mxu0 %v2169_v17 }
 0x19f   :  { %2111 = vmatprep.mubr.msk.bf16.mxu0 %vm2447_vm0, %v3257_v42 }
 0x206   :  { %v693_v28 = vpop.f32.mrf.mxu0 }
 0x207   :  { %v733_v38 = vpop.f32.mrf.mxu1 }
 0x208   :  { %v2938_v36 = vadd.f32 %v733_v38, %v693_v28  ;;  %v1969_v1 = vpop.f32.mrf.mxu0 }
 0x209   :  { %v1989_v43 = vpop.f32.mrf.mxu1 }
 0x20a   :  { %v696_v5 = vpop.f32.mrf.mxu0 }
 0x20b   :  { %v736_v4 = vpop.f32.mrf.mxu1 }
 0x20c   :  { %v1970_v0 = vpop.f32.mrf.mxu0 }
 0x20d   :  { %v1990_v33 = vpop.f32.mrf.mxu1 }
 0x226   :  { %v2009_v51 = vpop.f32.mrf.mxu0 }
 0x227   :  { %v2996_v29 = vadd.f32 %v2009_v51, %v3268_v56 }
 0x228   :  { %v838_v16 = vpop.f32.mrf.mxu0 }
 0x229   :  { %v3001_v7 = vadd.f32 %v3268_v56, %v838_v16  ;;  %v1701_v25 = vmul.f32 -1.442695, %v2996_v29 }
 0x22a   :  { %v2010_v45 = vpop.f32.mrf.mxu0 }
 0x22b   :  { %v3007_v58 = vadd.f32 %v2010_v45, %v3268_v56  ;;  %v1699_v6 = vmul.f32 -1.442695, %v3001_v7 }
 0x22c   :  { %v2940_v12 = vpop.f32.mrf.mxu0 }
 0x22d   :  { %v1702_v43 = vmul.f32 -1.442695, %v3007_v58  ;;  %v3018_v5 = vadd.f32 %v3268_v56, %v2940_v12 }
 0x22e   :  { %v2013_v20 = vpop.f32.mrf.mxu0 }
 0x22f   :  { %v2943_v11 = vadd.f32 %v2013_v20, %v3268_v56 }
 0x230   :  { %v854_v62 = vpop.f32.mrf.mxu0 }
 0x231   :  { %v1705_v34 = vmul.f32 -1.442695, %v2943_v11  ;;  %v2960_v13 = vadd.f32 %v3268_v56, %v854_v62 }
 0x232   :  { %v2014_v14 = vpop.f32.mrf.mxu0 }
 0x233   :  { %v1703_v30 = vmul.f32 -1.442695, %v2960_v13  ;;  %v2982_v47 = vadd.f32 %v2014_v14, %v3268_v56  ;;  %v1700_v14 = vmul.f32 -1.442695, %v3018_v5 }
 0x234   :  { %v857_v22 = vpop.f32.mrf.mxu0 }
 0x235   :  { %v2989_v9 = vadd.f32 %v3268_v56, %v857_v22  ;;  %v1706_v26 = vmul.f32 -1.442695, %v2982_v47 }
 0x236   :  { %v2017_v61 = vpop.f32.mrf.mxu0 }
 0x237   :  { %v2953_v24 = vadd.f32 %v2017_v61, %v3268_v56  ;;  %v1704_v59 = vmul.f32 -1.442695, %v2989_v9 }
 0x238   :  { %v870_v37 = vpop.f32.mrf.mxu0 }
 0x239   :  { %v1709_v19 = vmul.f32 -1.442695, %v2953_v24  ;;  %v2976_v23 = vadd.f32 %v3268_v56, %v870_v37 }
 0x23a   :  { %v2018_v53 = vpop.f32.mrf.mxu0 }
 0x23b   :  { %v2946_v63 = vadd.f32 %v2018_v53, %v3268_v56  ;;  %v1707_v48 = vmul.f32 -1.442695, %v2976_v23 }
 0x23c   :  { %v873_v39 = vpop.f32.mrf.mxu0 }
 0x23d   :  { %v1710_v44 = vmul.f32 -1.442695, %v2946_v63  ;;  %v2968_v15 = vadd.f32 %v3268_v56, %v873_v39 }
 0x23e   :  { %v2021_v35 = vpop.f32.mrf.mxu0 }
 0x23f   :  { %v2949_v46 = vadd.f32 %v2021_v35, %v3268_v56  ;;  %v1708_v18 = vmul.f32 -1.442695, %v2968_v15 }
 0x240   :  { %v886_v54 = vpop.f32.mrf.mxu0 }
 0x241   :  { %v1713_v41 = vmul.f32 -1.442695, %v2949_v46  ;;  %v2957_v52 = vadd.f32 %v3268_v56, %v886_v54 }
 0x242   :  { %v2022_v55 = vpop.f32.mrf.mxu0 }
 0x243   :  { %v1711_v50 = vmul.f32 -1.442695, %v2957_v52  ;;  %v2965_v60 = vadd.f32 %v2022_v55, %v3268_v56  ;;  %2310 = vpow2.f32 %v1713_v41 }
 0x244   :  { %v889_v3 = vpop.f32.mrf.mxu0  ;;  %2312 = vpow2.f32 %v1705_v34 }
 0x245   :  { %v1714_v8 = vmul.f32 -1.442695, %v2965_v60  ;;  %v2973_v40 = vadd.f32 %v3268_v56, %v889_v3  ;;  %2314 = vpow2.f32 %v1711_v50 }
 0x246   :  { %v2978_v10 = vpop.f32.mrf.mxu0  ;;  %2316 = vpow2.f32 %v1710_v44 }
 0x247   :  { %v1712_v31 = vmul.f32 -1.442695, %v2973_v40  ;;  %2318 = vpow2.f32 %v1714_v8 }
 0x248   :  { %v2986_v27 = vpop.f32.mrf.mxu0  ;;  %2320 = vpow2.f32 %v1709_v19 }
 0x249   :  { %2322 = vpow2.f32 %v1712_v31 }
 0x24a   :  { %v2992_v57 = vpop.f32.mrf.mxu0  ;;  %2324 = vpow2.f32 %v1703_v30 }
 0x24b   :  { %2326 = vpow2.f32 %v1708_v18 }
 0x24c   :  { %v2998_v49 = vpop.f32.mrf.mxu0  ;;  %2328 = vpow2.f32 %v1707_v48 }
 0x24d   :  { %2330 = vpow2.f32 %v1706_v26 }
 0x24e   :  { %v3004_v21 = vpop.f32.mrf.mxu0  ;;  %2332 = vpow2.f32 %v1704_v59 }
 0x24f   :  { %2334 = vpow2.f32 %v1701_v25  ;;  %v3032_v25 = vld [vmem:[%s3219_s5] ss:$0 sm:$0xff] }
 0x250   :  { %v3010_v2 = vpop.f32.mrf.mxu0  ;;  %v2311_v32 = vpop.eup %2310  ;;  %2336 = vpow2.f32 %v1699_v6 }
 0x251   :  { %v2313_v17 = vpop.eup %2312  ;;  %v963_v28 = vadd.f32 1.0, %v2311_v32 }
 0x252   :  { %v3013_v38 = vpop.f32.mrf.mxu0  ;;  %v2315_v1 = vpop.eup %2314  ;;  %v955_v39 = vadd.f32 1.0, %v2313_v17 }
 0x253   :  { %v2317_v4 = vpop.eup %2316  ;;  %v961_v51 = vadd.f32 1.0, %v2315_v1  ;;  %2338 = vrcp.f32 %v963_v28 }
 0x254   :  { %v3020_v0 = vpop.f32.mrf.mxu0  ;;  %v2319_v33 = vpop.eup %2318  ;;  %2340 = vpow2.f32 %v1702_v43  ;;  %v960_v61 = vadd.f32 1.0, %v2317_v4 }
 0x255   :  { %v2321_v16 = vpop.eup %2320  ;;  %v964_v45 = vadd.f32 1.0, %v2319_v33 }
 0x256   :  { %v2069_v20 = vpop.f32.mrf.mxu0  ;;  %v2323_v62 = vpop.eup %2322  ;;  %v959_v35 = vadd.f32 1.0, %v2321_v16 }
 0x257   :  { %v2325_v22 = vpop.eup %2324  ;;  %2342 = vrcp.f32 %v964_v45  ;;  %v962_v12 = vadd.f32 1.0, %v2323_v62  ;;  %v3035_v32 = vadd.f32 %v3032_v25, %v2069_v20 }
 0x258   :  { %v1195_v37 = vpop.f32.mrf.mxu0  ;;  %v2327_v53 = vpop.eup %2326  ;;  %2344 = vrcp.f32 %v961_v51  ;;  %v953_v41 = vadd.f32 1.0, %v2325_v22 }
 0x259   :  { %2346 = vrcp.f32 %v962_v12  ;;  %v2329_v34 = vpop.eup %2328  ;;  %v958_v44 = vadd.f32 1.0, %v2327_v53  ;;  %v1750_v62 = vmul.f32 -1.442695, %v3035_v32 }
 0x25a   :  { %v2070_v54 = vpop.f32.mrf.mxu0  ;;  %2348 = vpow2.f32 %v1700_v14  ;;  %v2331_v55 = vpop.eup %2330  ;;  %v957_v19 = vadd.f32 1.0, %v2329_v34  ;;  %v3061_v34 = vadd.f32 %v3032_v25, %v3013_v38  ;;  %v3069_v38 = vadd.f32 %v3032_v25, %v3004_v21 }
 0x25b   :  { %2350 = vrcp.f32 %v960_v61  ;;  %v2333_v3 = vpop.eup %2332  ;;  %v956_v30 = vadd.f32 1.0, %v2331_v55  ;;  %v3024_v31 = vadd.f32 %v2070_v54, %v3268_v56 }
 0x25c   :  { %v1198_v50 = vpop.f32.mrf.mxu0  ;;  %2352 = vrcp.f32 %v955_v39  ;;  %v2335_v26 = vpop.eup %2334  ;;  %v954_v59 = vadd.f32 1.0, %v2333_v3  ;;  %v3057_v39 = vadd.f32 %v3032_v25, %v1195_v37 }
 0x25d   :  { %2354 = vrcp.f32 %v959_v35  ;;  %v2337_v28 = vpop.eup %2336  ;;  %v1751_v43 = vmul.f32 -1.442695, %v3024_v31  ;;  %v3047_v16 = vadd.f32 %v3032_v25, %v1198_v50  ;;  %v951_v37 = vadd.f32 1.0, %v2335_v26 }
 0x25e   :  { %v2073_v8 = vpop.f32.mrf.mxu0  ;;  %2356 = vrcp.f32 %v953_v41  ;;  %v1747_v26 = vmul.f32 -1.442695, %v3061_v34 }
 0x25f   :  { %v3027_v18 = vadd.f32 %v2073_v8, %v3268_v56  ;;  %2358 = vrcp.f32 %v958_v44  ;;  %v1748_v8 = vmul.f32 -1.442695, %v3057_v39 }
 0x260   :  { %v1211_v48 = vpop.f32.mrf.mxu0  ;;  %2360 = vrcp.f32 %v957_v19  ;;  %v2339_v1 = vpop.eup %2338 }
 0x261   :  { %v1754_v6 = vmul.f32 -1.442695, %v3027_v18  ;;  %v3039_v17 = vadd.f32 %v3032_v25, %v1211_v48  ;;  %2362 = vrcp.f32 %v956_v30  ;;  %v2341_v51 = vpop.eup %2340  ;;  %v1011_v12 = vmul.f32 %v2339_v1, %v2949_v46 }
 0x262   :  { %v2074_v56 = vpop.f32.mrf.mxu0  ;;  %v952_v54 = vadd.f32 1.0, %v2341_v51  ;;  %v1749_v46 = vmul.f32 -1.442695, %v3047_v16  ;;  %v3074_v48 = vadd.f32 %v3032_v25, %v2978_v10  ;;  %v949_v1 = vadd.f32 1.0, %v2337_v28 }
 0x263   :  { %v1752_v4 = vmul.f32 -1.442695, %v3039_v17  ;;  %v3044_v33 = vadd.f32 %v3032_v25, %v2074_v56  ;;  %2364 = vpow2.f32 %v1754_v6  ;;  %v3083_v6 = vadd.f32 %v3032_v25, %v3020_v0 }
 0x264   :  { %v1214_v45 = vpop.f32.mrf.mxu0  ;;  %v2343_v20 = vpop.eup %2342  ;;  %2366 = vrcp.f32 %v954_v59  ;;  %v3087_v10 = vadd.f32 %v3032_v25, %v3010_v2  ;;  %v1742_v51 = vmul.f32 -1.442695, %v3074_v48  ;;  %v3094_v0 = vadd.f32 %v3032_v25, %v2992_v57 }
 0x265   :  { %v1755_v14 = vmul.f32 -1.442695, %v3044_v33  ;;  %v3052_v22 = vadd.f32 %v3032_v25, %v1214_v45  ;;  %v2345_v61 = vpop.eup %2344  ;;  %v1012_v53 = vmul.f32 %v2343_v20, %v2965_v60  ;;  %2368 = vpow2.f32 %v1752_v4 }
 0x266   :  { %v2347_v35 = vpop.eup %2346  ;;  %2370 = vpow2.f32 %v1751_v43  ;;  %v1009_v19 = vmul.f32 %v2345_v61, %v2957_v52  ;;  %v1746_v4 = vmul.f32 -1.442695, %v3069_v38 }
 0x267   :  { %v1753_v41 = vmul.f32 -1.442695, %v3052_v22  ;;  %v2349_v55 = vpop.eup %2348  ;;  %v1022_v44 = vpack.c.bf16 %v1012_v53, %v1011_v12  ;;  %v1010_v50 = vmul.f32 %v2347_v35, %v2973_v40  ;;  %2372 = vpow2.f32 %v1755_v14 }
 0x268   :  { %v2351_v60 = vpop.eup %2350  ;;  %2374 = vpow2.f32 %v1750_v62  ;;  %v950_v40 = vadd.f32 1.0, %v2349_v55  ;;  %v1744_v62 = vmul.f32 -1.442695, %v3087_v10  ;;  %v1743_v35 = vmul.f32 -1.442695, %v3094_v0 }
 0x269   :  { %v2353_v3 = vpop.eup %2352  ;;  %2376 = vpow2.f32 %v1753_v41  ;;  %2024 = vmatpush3.bf16.msra.mxu1 %v1022_v44  ;;  %v1008_v21 = vmul.f32 %v2351_v60, %v2946_v63  ;;  %v1021_v59 = vpack.c.bf16 %v1010_v50, %v1009_v19  ;;  %v3111_v44 = vadd.f32 %v3032_v25, %v2986_v27 }
 0x26a   :  { %v2355_v30 = vpop.eup %2354  ;;  %2378 = vrcp.f32 %v952_v54  ;;  %2025 = vmatprep.subr.bf16.mxu1 %v3257_v42 }
 0x26b   :  { %v3078_v52 = vpop.eup %2356  ;;  %2380 = vpow2.f32 %v1749_v46  ;;  %v1007_v43 = vmul.f32 %v2355_v30, %v2953_v24  ;;  %v1745_v24 = vmul.f32 -1.442695, %v3083_v6 }
 0x26c   :  { %v2359_v56 = vpop.eup %2358  ;;  %2382 = vrcp.f32 %v951_v37 }
 0x26d   :  { %2384 = vpow2.f32 %v1748_v8  ;;  %2026 = vmatpush3.bf16.msra.mxu1 %v1021_v59  ;;  %v2361_v63 = vpop.eup %2360  ;;  %v1020_v45 = vpack.c.bf16 %v1008_v21, %v1007_v43  ;;  %v1006_v2 = vmul.f32 %v2359_v56, %v2968_v15  ;;  %v3105_v15 = vadd.f32 %v3032_v25, %v2998_v49 }
 0x26e   :  { %2386 = vrcp.f32 %v950_v40  ;;  %2027 = vmatprep.subr.bf16.mxu1 %v3257_v42  ;;  %v2363_v28 = vpop.eup %2362  ;;  %v1005_v61 = vmul.f32 %v2361_v63, %v2976_v23  ;;  %v1003_v23 = vmul.f32 %v2353_v3, %v2943_v11  ;;  %v1740_v8 = vmul.f32 -1.442695, %v3111_v44 }
 0x26f   :  { %2388 = vpow2.f32 %v1747_v26  ;;  %v1004_v53 = vmul.f32 %v2363_v28, %v2982_v47  ;;  %v1741_v37 = vmul.f32 -1.442695, %v3105_v15  ;;  %v1001_v40 = vmul.f32 %v3078_v52, %v2960_v13 }
 0x270   :  { %v2365_v20 = vpop.eup %2364  ;;  %2390 = vrcp.f32 %v949_v1  ;;  %v1019_v41 = vpack.c.bf16 %v1006_v2, %v1005_v61 }
 0x271   :  { %v2367_v14 = vpop.eup %2366  ;;  %2392 = vpow2.f32 %v1746_v4  ;;  %v1288_v12 = vadd.f32 1.0, %v2365_v20  ;;  %2028 = vmatpush3.bf16.msra.mxu1 %v1020_v45  ;;  %v1018_v60 = vpack.c.bf16 %v1004_v53, %v1003_v23 }
 0x272   :  { %v2369_v57 = vpop.eup %2368  ;;  %2394 = vpow2.f32 %v1742_v51  ;;  %2029 = vmatprep.subr.bf16.mxu1 %v3257_v42  ;;  %v1002_v11 = vmul.f32 %v2367_v14, %v2989_v9 }
 0x273   :  { %v2371_v54 = vpop.eup %2370  ;;  %2396 = vpow2.f32 %v1745_v24  ;;  %v1286_v47 = vadd.f32 1.0, %v2369_v57 }
 0x274   :  { %v2373_v55 = vpop.eup %2372  ;;  %2398 = vpow2.f32 %v1744_v62  ;;  %v1285_v3 = vadd.f32 1.0, %v2371_v54  ;;  %v1017_v56 = vpack.c.bf16 %v1002_v11, %v1001_v40 }
 0x275   :  { %v2375_v50 = vpop.eup %2374  ;;  %2400 = vrcp.f32 %v1288_v12  ;;  %v1289_v46 = vadd.f32 1.0, %v2373_v55  ;;  %2030 = vmatpush3.bf16.msra.mxu1 %v1019_v41 }
 0x276   :  { %v2377_v49 = vpop.eup %2376  ;;  %2402 = vpow2.f32 %v1743_v35  ;;  %2031 = vmatprep.subr.bf16.mxu1 %v3257_v42  ;;  %v1284_v26 = vadd.f32 1.0, %v2375_v50 }
 0x277   :  { %v2379_v19 = vpop.eup %2378  ;;  %2404 = vrcp.f32 %v1289_v46  ;;  %v1287_v27 = vadd.f32 1.0, %v2377_v49 }
 0x278   :  { %v2381_v25 = vpop.eup %2380  ;;  %2406 = vrcp.f32 %v1286_v47  ;;  %v1000_v9 = vmul.f32 %v2379_v19, %v3007_v58 }
 0x279   :  { %v2383_v30 = vpop.eup %2382  ;;  %2408 = vrcp.f32 %v1287_v27  ;;  %2032 = vmatpush3.bf16.msra.mxu1 %v1018_v60  ;;  %v1283_v1 = vadd.f32 1.0, %v2381_v25 }
 0x27a   :  { %v2385_v21 = vpop.eup %2384  ;;  %2410 = vpow2.f32 %v1741_v37  ;;  %2033 = vmatprep.subr.bf16.mxu1 %v3257_v42  ;;  %v999_v63 = vmul.f32 %v2383_v30, %v2996_v29 }
 0x27b   :  { %v2387_v59 = vpop.eup %2386  ;;  %2412 = vrcp.f32 %v1285_v3  ;;  %v1282_v13 = vadd.f32 1.0, %v2385_v21 }
 0x27c   :  { %v2389_v43 = vpop.eup %2388  ;;  %2414 = vpow2.f32 %v1740_v8  ;;  %v1016_v28 = vpack.c.bf16 %v1000_v9, %v999_v63  ;;  %v998_v45 = vmul.f32 %v2387_v59, %v3018_v5 }
 0x27d   :  { %v2391_v4 = vpop.eup %2390  ;;  %2416 = vrcp.f32 %v1284_v26  ;;  %2034 = vmatpush3.bf16.msra.mxu1 %v1017_v56  ;;  %v1281_v2 = vadd.f32 1.0, %v2389_v43 }
 0x27e   :  { %v2393_v52 = vpop.eup %2392  ;;  %2035 = vmatprep.subr.bf16.mxu1 %v3257_v42  ;;  %2418 = vrcp.f32 %v1283_v1  ;;  %v997_v20 = vmul.f32 %v2391_v4, %v3001_v7  ;;  %v1715_v7 = vld [vmem:[%s3220_s2 + $0x8] sm:$0xf] }
 0x27f   :  { %v2395_v51 = vpop.eup %2394  ;;  %v1280_v62 = vadd.f32 1.0, %v2393_v52  ;;  %2420 = vrcp.f32 %v1282_v13 }
 0x280   :  { %v2397_v58 = vpop.eup %2396  ;;  %v1015_v61 = vpack.c.bf16 %v998_v45, %v997_v20  ;;  %2422 = vrcp.f32 %v1281_v2  ;;  %v2174_v45 = vld [vmem:[%s3221_s3 + $0x18] sm:$0xff]   ;;  %v2175_v2 = vld [vmem:[%s3221_s3 + $0x10] sm:$0xff]  }
 0x281   :  { %v2399_v24 = vpop.eup %2398  ;;  %2036 = vmatpush3.bf16.msra.mxu1 %v1016_v28  ;;  %v1279_v12 = vadd.f32 1.0, %v2397_v58  ;;  %2424 = vrcp.f32 %v1280_v62  ;;  %v2173_v28 = vld [vmem:[%s3221_s3 + $0x20] sm:$0xff]   ;;  %v2176_v58 = vld [vmem:[%s3221_s3 + $0x8] sm:$0xff]  }
 0x282   :  { %v2401_v29 = vpop.eup %2400  ;;  %2037 = vmatprep.subr.bf16.mxu1 %v3257_v42  ;;  %v1278_v5 = vadd.f32 1.0, %v2399_v24  ;;  %v2177_v24 = vld [vmem:[%s3221_s3] sm:$0xff]  }
 0x283   :  { %v2403_v14 = vpop.eup %2402  ;;  %v1336_v35 = vmul.f32 %v2401_v29, %v3027_v18  ;;  %2426 = vrcp.f32 %v1279_v12  ;;  %v1276_v18 = vadd.f32 1.0, %v2395_v51 }
 0x284   :  { %v2405_v57 = vpop.eup %2404  ;;  %v1277_v23 = vadd.f32 1.0, %v2403_v14  ;;  %2428 = vrcp.f32 %v1278_v5 }
 0x285   :  { %v2407_v53 = vpop.eup %2406  ;;  %v1337_v54 = vmul.f32 %v2405_v57, %v3044_v33  ;;  %2038 = vmatpush3.bf16.msra.mxu1 %v1015_v61 }
 0x286   :  { %v2409_v41 = vpop.eup %2408  ;;  %2075 = vmatprep.subr.bf16.mxu1 %v3257_v42  ;;  %v1334_v33 = vmul.f32 %v2407_v53, %v3039_v17  ;;  %2430 = vrcp.f32 %v1277_v23 }
 0x287   :  { %v2411_v55 = vpop.eup %2410  ;;  %v1347_v47 = vpack.c.bf16 %v1337_v54, %v1336_v35  ;;  %v1335_v50 = vmul.f32 %v2409_v41, %v3052_v22  ;;  %2432 = vrcp.f32 %v1276_v18  ;;  %v2179_v41 = vld [vmem:[%s3222_s4 + $0x10] sm:$0xff]  }
 0x288   :  { %v2413_v46 = vpop.eup %2412  ;;  %2040 = vmatmul.mubr.bf16.vlgmr.msra.gmra.mxu1 %v1715_v7  ;;  %v1275_v37 = vadd.f32 1.0, %v2411_v55  ;;  %v2178_v7 = vld [vmem:[%s3222_s4 + $0x18] sm:$0xff]  }
 0x289   :  { %v2415_v49 = vpop.eup %2414  ;;  %2076 = vmatpush3.bf16.msra.mxu1 %v1347_v47  ;;  %2091 = vmatprep.mubr.msk.bf16.mxu1 %vm2447_vm0, %v3257_v42  ;;  %v1333_v19 = vmul.f32 %v2413_v46, %v3024_v31  ;;  %v1346_v11 = vpack.c.bf16 %v1335_v50, %v1334_v33  ;;  %v2180_v47 = vld [vmem:[%s3222_s4 + $0x8] sm:$0xff]  }
 0x28a   :  { %v2417_v60 = vpop.eup %2416  ;;  %2077 = vmatprep.subr.bf16.mxu1 %v3257_v42  ;;  %v1274_v3 = vadd.f32 1.0, %v2415_v49  ;;  %2434 = vrcp.f32 %v1275_v37  ;;  %v2181_v49 = vld [vmem:[%s3222_s4] sm:$0xff]  }
 0x28b   :  { %v2419_v22 = vpop.eup %2418  ;;  %v1332_v27 = vmul.f32 %v2417_v60, %v3035_v32 }
 0x28c   :  { %v2421_v25 = vpop.eup %2420  ;;  %v1331_v8 = vmul.f32 %v2419_v22, %v3047_v16  ;;  %2436 = vrcp.f32 %v1274_v3 }
 0x28d   :  { %2078 = vmatpush3.bf16.msra.mxu1 %v1346_v11  ;;  %v1345_v17 = vpack.c.bf16 %v1333_v19, %v1332_v27  ;;  %v2423_v30 = vpop.eup %2422  ;;  %v1330_v40 = vmul.f32 %v2421_v25, %v3057_v39 }
 0x28e   :  { %2079 = vmatprep.subr.bf16.mxu1 %v3257_v42  ;;  %v2425_v31 = vpop.eup %2424  ;;  %v1329_v26 = vmul.f32 %v2423_v30, %v3061_v34 }
 0x28f   :  { %v1344_v21 = vpack.c.bf16 %v1331_v8, %v1330_v40  ;;  %v1328_v59 = vmul.f32 %v2425_v31, %v3069_v38 }
 0x290   :  { %v2427_v32 = vpop.eup %2426 }
 0x291   :  { %2080 = vmatpush3.bf16.msra.mxu1 %v1345_v17  ;;  %v2429_v9 = vpop.eup %2428  ;;  %v1343_v56 = vpack.c.bf16 %v1329_v26, %v1328_v59  ;;  %v1327_v16 = vmul.f32 %v2427_v32, %v3083_v6  ;;  %v1767_v17 = vld [vmem:[%s3219_s5 + $0x2] ss:$0 sm:$0xff] }
 0x292   :  { %2081 = vmatprep.subr.bf16.mxu1 %v3257_v42  ;;  %v1326_v39 = vmul.f32 %v2429_v9, %v3087_v10 }
 0x293   :  { %v2431_v1 = vpop.eup %2430 }
 0x294   :  { %v2433_v43 = vpop.eup %2432  ;;  %v1325_v34 = vmul.f32 %v2431_v1, %v3094_v0  ;;  %v1342_v4 = vpack.c.bf16 %v1327_v16, %v1326_v39  ;;  %v1756_v0 = vld [vmem:[%s3220_s2 + $0xc] sm:$0xf] }
 0x295   :  { %2082 = vmatpush3.bf16.msra.mxu1 %v1344_v21  ;;  %v1324_v38 = vmul.f32 %v2433_v43, %v3074_v48  ;;  %v2170_v48 = vld [vmem:[%s3221_s3 + $0x38] sm:$0xff]  }
 0x296   :  { %2083 = vmatprep.subr.bf16.mxu1 %v3257_v42  ;;  %2096 = vmatpush3.bf16.msra.mxu0 %v2170_v48 }
 0x297   :  { %v2435_v63 = vpop.eup %2434  ;;  %v1341_v52 = vpack.c.bf16 %v1325_v34, %v1324_v38  ;;  %2097 = vmatprep.subr.bf16.mxu0 %v3257_v42 }
 0x298   :  { %v1323_v6 = vmul.f32 %v2435_v63, %v3105_v15  ;;  %v2171_v15 = vld [vmem:[%s3221_s3 + $0x30] sm:$0xff]  }
 0x299   :  { %2084 = vmatpush3.bf16.msra.mxu1 %v1343_v56  ;;  %v2437_v13 = vpop.eup %2436 }
 0x29a   :  { %2085 = vmatprep.subr.bf16.mxu1 %v3257_v42  ;;  %v1322_v51 = vmul.f32 %v2437_v13, %v3111_v44  ;;  %2098 = vmatpush3.bf16.msra.mxu0 %v2171_v15  ;;  %v2172_v44 = vld [vmem:[%s3221_s3 + $0x28] sm:$0xff]  }
 0x29b   :  { %2099 = vmatprep.subr.bf16.mxu0 %v3257_v42 }
 0x29c   :  { %v1340_v10 = vpack.c.bf16 %v1323_v6, %v1322_v51 }
 0x29d   :  { %2086 = vmatpush3.bf16.msra.mxu1 %v1342_v4 }
 0x29e   :  { %2087 = vmatprep.subr.bf16.mxu1 %v3257_v42  ;;  %2100 = vmatpush3.bf16.msra.mxu0 %v2172_v44 }
 0x29f   :  { %2101 = vmatprep.subr.bf16.mxu0 %v3257_v42 }
 0x2a1   :  { %2088 = vmatpush3.bf16.msra.mxu1 %v1341_v52 }
 0x2a2   :  { %2089 = vmatprep.subr.bf16.mxu1 %v3257_v42  ;;  %2102 = vmatpush3.bf16.msra.mxu0 %v2173_v28 }
 0x2a3   :  { %2103 = vmatprep.subr.bf16.mxu0 %v3257_v42 }
 0x2a5   :  { %2090 = vmatpush3.bf16.msra.mxu1 %v1340_v10 }
 0x2a6   :  { %2115 = vmatprep.subr.bf16.mxu1 %v3257_v42  ;;  %2104 = vmatpush3.bf16.msra.mxu0 %v2174_v45 }
 0x2a7   :  { %2105 = vmatprep.subr.bf16.mxu0 %v3257_v42 }
 0x2a8   :  { %2092 = vmatmul.mubr.bf16.vlgmr.msra.gmra.mxu1 %v1756_v0 }
 0x2a9   :  { %2123 = vmatprep.mubr.msk.bf16.mxu1 %vm2447_vm0, %v3257_v42  ;;  %2116 = vmatpush3.bf16.msra.mxu1 %v2178_v7 }
 0x2aa   :  { %2106 = vmatpush3.bf16.msra.mxu0 %v2175_v2  ;;  %2117 = vmatprep.subr.bf16.mxu1 %v3257_v42 }
 0x2ab   :  { %2107 = vmatprep.subr.bf16.mxu0 %v3257_v42 }
 0x2ad   :  { %2118 = vmatpush3.bf16.msra.mxu1 %v2179_v41 }
 0x2ae   :  { %2108 = vmatpush3.bf16.msra.mxu0 %v2176_v58  ;;  %2119 = vmatprep.subr.bf16.mxu1 %v3257_v42 }
 0x2af   :  { %2109 = vmatprep.subr.bf16.mxu0 %v3257_v42 }
 0x2b1   :  { %2120 = vmatpush3.bf16.msra.mxu1 %v2180_v47 }
 0x2b2   :  { %2110 = vmatpush3.bf16.msra.mxu0 %v2177_v24  ;;  %2121 = vmatprep.subr.bf16.mxu1 %v3257_v42 }
 0x2b5   :  { %2122 = vmatpush3.bf16.msra.mxu1 %v2181_v49 }
 0x348   :  { %v1057_v20 = vpop.f32.mrf.mxu1 }
 0x349   :  { %v1063_v61 = vadd.f32 %v1057_v20, %v2938_v36  ;;  %v1757_v36 = vld [vmem:[%s3219_s5 + $0x1] ss:$0 sm:$0xff] }
 0x34a   :  { %v2041_v62 = vpop.f32.mrf.mxu1 }
 0x34c   :  { %v1060_v29 = vpop.f32.mrf.mxu1 }
 0x34e   :  { %v2042_v14 = vpop.f32.mrf.mxu1 }
 0x368   :  { %v1382_v12 = vpop.f32.mrf.mxu1 }
 0x369   :  { %v1388_v57 = vadd.f32 %v1382_v12, %v1063_v61 }
 0x36a   :  { %v2093_v53 = vpop.f32.mrf.mxu1 }
 0x36b   :  { %v1389_v5 = vpack.c.bf16 %v1388_v57, %v1388_v57 }
 0x36c   :  { %v1385_v35 = vpop.f32.mrf.mxu1 }
 0x36d   :  { %2112 = vmatmul.mubr.bf16.vlgmr.msra.gmra.mxu0 %v1389_v5 }
 0x36e   :  { %v2094_v54 = vpop.f32.mrf.mxu1 }
 0x42d   :  { %v1493_v55 = vpop.f32.mrf.mxu0 }
 0x42e   :  { %v1494_v23 = vadd.f32 %v1757_v36, %v1493_v55 }
 0x42f   :  { %v2113_v50 = vpop.f32.mrf.mxu0 }
 0x430   :  { %1507 = vrot.lane.b32.xlu0 %v1494_v23, %s2448_s17  ;;  %v1766_v33 = vmul.f32 -1.442695, %v1494_v23 }
 0x431   :  { %v1496_v46 = vpop.f32.mrf.mxu0 }
 0x432   :  { %2438 = vpow2.f32 %v1766_v33 }
 0x433   :  { %v2114_v18 = vpop.f32.mrf.mxu0 }
 0x43f   :  { %v2439_v60 = vpop.eup %2438 }
 0x440   :  { %v1502_v37 = vadd.f32 1.0, %v2439_v60 }
 0x442   :  { %2440 = vrcp.f32 %v1502_v37 }
 0x44f   :  { %v2441_v19 = vpop.eup %2440 }
 0x450   :  { %v1505_v11 = vmul.f32 %v2441_v19, %v1494_v23 }
 0x4a2   :  { %v1508_v22 = vpop.permute.xlu0 %1507 }
 0x4a3   :  { %v1510_v3 = vmul.f32 %v1508_v22, %v1505_v11 }
 0x4a5   :  { %v1511_v27 = vpack.c.bf16 %v1510_v3, %v1510_v3 }
 0x4a7   :  { %1526 = vrot.lane.b32.xlu0 %v1511_v27, %s2448_s17 }
 0x519   :  { %v1527_v25 = vpop.permute.xlu0 %1526 }
 0x51a   :  { %2124 = vmatmul.mubr.msk.bf16.vlgmr.msra.gmra.mxu1 %vm1552_vm1, %v1527_v25 }
 0x5da   :  { %v1590_v42 = vpop.f32.mrf.mxu1 }
 0x5db   :  { %v1591_v8 = vadd.f32 %v1767_v17, %v1590_v42 }
 0x5dc   :  { %v2125_v30 = vpop.f32.mrf.mxu1 }
 0x5dd   :  { %1596 = vst [vmem:[%s3223_s6] sm:$0xff] %v1591_v8 }
 0x5de   :  { %v1593_v40 = vpop.f32.mrf.mxu1 }
 0x5e0   :  { %v2126_v31 = vpop.f32.mrf.mxu1 }

</bundles_post_ra>
